<compile_context>
chip_gen: v7x
topology: tpu7x:2x2x1
jax: 0.10.0
libtpu: 0.0.40
codegen_flags: <defaults>
</compile_context>

<pallas_src>
import functools

import jax
import jax.numpy as jnp
import numpy as np
from jax import lax
from jax.experimental import pallas as pl
from jax.experimental.pallas import tpu as pltpu


def _pattern_formation_kernel(m_ref, v_ref, mprev_ref, vprev_ref, mnext_ref,
                              vnext_ref, out_ref, *, f, tr, nb,
                              reaction_rate, pattern_complexity):
    """tanh(m + rr*v) -> 3-tap edge-replicated mean -> blend, on a (tr,128) block."""
    rr = jnp.float32(reaction_rate)
    u = jnp.tanh(m_ref[...] + v_ref[...] * rr)            # (tr, 128) f32

    if f <= 3:
        # PyTorch skips smoothing for fields of <= 3 cells; blend collapses to u.
        out_ref[...] = u
        return

    b = pl.program_id(0)
    ridx = lax.broadcasted_iota(jnp.int32, u.shape, 0)
    cidx = lax.broadcasted_iota(jnp.int32, u.shape, 1)

    # Within-row neighbours via lane rolls (XLU slot, free next to the VPU/EUP path).
    lft = pltpu.roll(u, 1, axis=1)            # lft[r,c] = u[r, (c-1) % 128]
    rgt = pltpu.roll(u, 127, axis=1)          # rgt[r,c] = u[r, (c+1) % 128]
    # Row-seam fixes (lane 0 / lane 127) via sublane rolls.
    lft_sub = pltpu.roll(lft, 1, axis=0)      # [r, 0]   -> u[r-1, 127]
    rgt_sub = pltpu.roll(rgt, tr - 1, axis=0)  # [r, 127] -> u[r+1, 0]

    # Block-seam values from the neighbouring grid blocks: last row of the previous
    # block (mprev/vprev row 7) and first row of the next block (mnext/vnext row 0),
    # recomputed from the raw inputs so every grid step is independent ("parallel").
    u_prev = jnp.tanh(mprev_ref[...][7:8, :] + vprev_ref[...][7:8, :] * rr)  # (1,128)
    u_next = jnp.tanh(mnext_ref[...][0:1, :] + vnext_ref[...][0:1, :] * rr)  # (1,128)
    prev_row = pltpu.roll(u_prev, 1, axis=1)      # lane 0   == u_prev[127]
    next_row = pltpu.roll(u_next, 127, axis=1)    # lane 127 == u_next[0]
    prev_row = prev_row * (b > 0).astype(jnp.float32)        # no block to the left
    next_row = next_row * (b < nb - 1).astype(jnp.float32)   # no block to the right

    left = jnp.where(cidx == 0,
                     jnp.where(ridx == 0, prev_row, lft_sub), lft)
    right = jnp.where(cidx == 127,
                      jnp.where(ridx == tr - 1, next_row, rgt_sub), rgt)
    neigh = left + right

    # Edge replication at flat index 0 and F-1 == 2x centre weight; 1/3 folded in.
    flat = b * (tr * 128) + ridx * 128 + cidx
    is_edge = jnp.logical_or(flat == 0, flat == f - 1)
    w3 = jnp.where(is_edge, jnp.float32(2.0 / 3.0), jnp.float32(1.0 / 3.0))

    smoothed = neigh * jnp.float32(1.0 / 3.0) + u * w3
    pc = jnp.float32(pattern_complexity)
    out_ref[...] = u + pc * (smoothed - u)


@functools.partial(
    jax.jit,
    static_argnames=("field_dimension", "pattern_complexity", "reaction_rate",
                     "block_rows"))
def bioelectric_pattern_formation(morphological_state, voltage_potential, *,
                                  field_dimension, pattern_complexity,
                                  reaction_rate, block_rows=1024):
    """Returns the updated morphological_state (shape (field_dimension,), f32)."""
    f = int(field_dimension)

    # Row-major (rows, 128) layout.  rows*128 is STRICTLY greater than f (even when
    # f % 128 == 0) so the one-past-the-end neighbour always lands on explicit zero
    # padding -- required for the edge-replication trick.  Do not "optimize" this.
    r_needed = f // 128 + 1
    r8 = ((r_needed + 7) // 8) * 8                 # sublane-dense (multiple of 8)
    tr = min(r8, max(8, (int(block_rows) // 8) * 8))  # rows per grid block
    r_pad = ((r8 + tr - 1) // tr) * tr             # whole blocks only (no partials)
    nb = r_pad // tr
    total = r_pad * 128
    assert total > f and tr % 8 == 0 and r_pad % tr == 0

    def prep(x):
        xf = jnp.ravel(x).astype(jnp.float32)
        n = xf.shape[0]
        if n > f:                                  # truncate
            xf = lax.slice(xf, (0,), (f,))
            n = f
        xf = lax.pad(xf, jnp.float32(0), [(0, total - n, 0)])   # zero-extend
        return xf.reshape(r_pad, 128)

    morph2 = prep(morphological_state)
    volt2 = prep(voltage_potential)

    kernel = functools.partial(
        _pattern_formation_kernel,
        f=f, tr=tr, nb=nb,
        reaction_rate=float(reaction_rate),
        pattern_complexity=float(pattern_complexity))

    trb = tr // 8          # block-of-8-rows units for the halo specs
    nrb = r_pad // 8

    out = pl.pallas_call(
        kernel,
        out_shape=jax.ShapeDtypeStruct((r_pad, 128), jnp.float32),
        grid=(nb,),
        in_specs=[
            pl.BlockSpec((tr, 128), lambda b: (b, 0)),                  # morph block
            pl.BlockSpec((tr, 128), lambda b: (b, 0)),                  # volt block
            # halo: 8-row group containing the last row of the previous block
            pl.BlockSpec((8, 128), lambda b: (jnp.maximum(b * trb - 1, 0), 0)),
            pl.BlockSpec((8, 128), lambda b: (jnp.maximum(b * trb - 1, 0), 0)),
            # halo: 8-row group containing the first row of the next block
            pl.BlockSpec((8, 128), lambda b: (jnp.minimum((b + 1) * trb, nrb - 1), 0)),
            pl.BlockSpec((8, 128), lambda b: (jnp.minimum((b + 1) * trb, nrb - 1), 0)),
        ],
        out_specs=pl.BlockSpec((tr, 128), lambda b: (b, 0)),
        compiler_params=pltpu.CompilerParams(
            dimension_semantics=("parallel",)),
    )(morph2, volt2, morph2, volt2, morph2, volt2)

    return out.reshape(-1)[:f]


def _reference(morph, voltage, field_dimension, pattern_complexity, reaction_rate):
    """Pure-JAX port of the PyTorch forward (correctness oracle)."""
    f = field_dimension

    def fit(x):
        x = jnp.ravel(x).astype(jnp.float32)
        if x.size >= f:
            return x[:f]
        return jnp.concatenate([x, jnp.zeros(f - x.size, jnp.float32)])

    m = fit(morph)
    v = fit(voltage)
    u = jnp.tanh(m + v * reaction_rate)
    if f > 3:
        left = jnp.concatenate([u[:1], u[:-1]])
        right = jnp.concatenate([u[1:], u[-1:]])
        s = (left + u + right) / 3.0
        return pattern_complexity * s + (1.0 - pattern_complexity) * u
    return u


if __name__ == "__main__":
    key = jax.random.PRNGKey(0)
    k1, k2, k3, k4 = jax.random.split(key, 4)

    pattern_complexity = 0.5
    reaction_rate = 0.3

    morph_small = jax.random.normal(k1, (8, 16), jnp.float32)    # 128 elements
    volt_small = jax.random.normal(k2, (12, 12), jnp.float32)    # 144 elements
    morph_big = jax.random.normal(k3, (48, 48), jnp.float32)     # 2304 elements
    volt_big = jax.random.normal(k4, (50, 50), jnp.float32)      # 2500 elements

    cases = [
        # (morph, volt, field_dimension, block_rows)
        (morph_small, volt_small, 100, 1024),  # truncation, single real lane-row
        (morph_small, volt_small, 200, 1024),  # zero-pad path + in-block row seam
        (morph_big,   volt_big,  2100,    8),  # multi-block grid + block seams
    ]
    for morph, volt, fdim, brows in cases:
        out = bioelectric_pattern_formation(
            morph, volt,
            field_dimension=fdim,
            pattern_complexity=pattern_complexity,
            reaction_rate=reaction_rate,
            block_rows=brows)
        out = jax.block_until_ready(out)

        ref = _reference(morph, volt, fdim, pattern_complexity, reaction_rate)
        assert out.shape == (fdim,)
        np.testing.assert_allclose(np.asarray(out), np.asarray(ref),
                                   rtol=1e-5, atol=1e-5)

    print("KERNEL_OK")
</pallas_src>

<mosaic_0001>
module attributes {stable_mosaic.version = 11 : i64} {
  func.func @_pattern_formation_kernel(%arg0: i32, %arg1: memref<8x128xf32, #tpu.memory_space<vmem>>, %arg2: memref<8x128xf32, #tpu.memory_space<vmem>>, %arg3: memref<8x128xf32, #tpu.memory_space<vmem>>, %arg4: memref<8x128xf32, #tpu.memory_space<vmem>>, %arg5: memref<8x128xf32, #tpu.memory_space<vmem>>, %arg6: memref<8x128xf32, #tpu.memory_space<vmem>>, %arg7: memref<8x128xf32, #tpu.memory_space<vmem>>) attributes {dimension_semantics = [#tpu.dimension_semantics<parallel>], iteration_bounds = array<i64: 1>, scalar_prefetch = 0 : i64, scratch_operands = 0 : i64, tpu.core_type = #tpu.core_type<tc>, window_params = [{transform_indices = @transform_0, window_bounds = array<i64: 8, 128>}, {transform_indices = @transform_1, window_bounds = array<i64: 8, 128>}, {transform_indices = @transform_2, window_bounds = array<i64: 8, 128>}, {transform_indices = @transform_3, window_bounds = array<i64: 8, 128>}, {transform_indices = @transform_4, window_bounds = array<i64: 8, 128>}, {transform_indices = @transform_5, window_bounds = array<i64: 8, 128>}, {transform_indices = @transform_6, window_bounds = array<i64: 8, 128>}]} {
    %c0 = arith.constant 0 : index
    %c0_0 = arith.constant 0 : index
    %0 = vector.load %arg1[%c0, %c0_0] : memref<8x128xf32, #tpu.memory_space<vmem>>, vector<8x128xf32>
    %c0_1 = arith.constant 0 : index
    %c0_2 = arith.constant 0 : index
    %1 = vector.load %arg2[%c0_1, %c0_2] : memref<8x128xf32, #tpu.memory_space<vmem>>, vector<8x128xf32>
    %cst = arith.constant 3.000000e-01 : f32
    %2 = vector.broadcast %cst : f32 to vector<8x128xf32>
    %3 = arith.mulf %1, %2 : vector<8x128xf32>
    %4 = arith.addf %0, %3 : vector<8x128xf32>
    %5 = math.tanh %4 : vector<8x128xf32>
    %6 = tpu.iota {dimensions = array<i32: 0>} : vector<8x128xi32>
    %7 = tpu.iota {dimensions = array<i32: 1>} : vector<8x128xi32>
    %c1_i32 = arith.constant 1 : i32
    %8 = tpu.dynamic_rotate %5 by %c1_i32 dim 1 : vector<8x128xf32>, i32 -> vector<8x128xf32>
    %c127_i32 = arith.constant 127 : i32
    %9 = tpu.dynamic_rotate %5 by %c127_i32 dim 1 : vector<8x128xf32>, i32 -> vector<8x128xf32>
    %c1_i32_3 = arith.constant 1 : i32
    %10 = tpu.dynamic_rotate %8 by %c1_i32_3 dim 0 : vector<8x128xf32>, i32 -> vector<8x128xf32>
    %c7_i32 = arith.constant 7 : i32
    %11 = tpu.dynamic_rotate %9 by %c7_i32 dim 0 : vector<8x128xf32>, i32 -> vector<8x128xf32>
    %c0_4 = arith.constant 0 : index
    %c0_5 = arith.constant 0 : index
    %12 = vector.load %arg3[%c0_4, %c0_5] : memref<8x128xf32, #tpu.memory_space<vmem>>, vector<8x128xf32>
    %13 = vector.extract_strided_slice %12 {offsets = [7, 0], sizes = [1, 128], strides = [1, 1]} : vector<8x128xf32> to vector<1x128xf32>
    %c0_6 = arith.constant 0 : index
    %c0_7 = arith.constant 0 : index
    %14 = vector.load %arg4[%c0_6, %c0_7] : memref<8x128xf32, #tpu.memory_space<vmem>>, vector<8x128xf32>
    %15 = vector.extract_strided_slice %14 {offsets = [7, 0], sizes = [1, 128], strides = [1, 1]} : vector<8x128xf32> to vector<1x128xf32>
    %cst_8 = arith.constant 3.000000e-01 : f32
    %16 = vector.broadcast %cst_8 : f32 to vector<1x128xf32>
    %17 = arith.mulf %15, %16 : vector<1x128xf32>
    %18 = arith.addf %13, %17 : vector<1x128xf32>
    %19 = math.tanh %18 : vector<1x128xf32>
    %c0_9 = arith.constant 0 : index
    %c0_10 = arith.constant 0 : index
    %20 = vector.load %arg5[%c0_9, %c0_10] : memref<8x128xf32, #tpu.memory_space<vmem>>, vector<8x128xf32>
    %21 = vector.extract_strided_slice %20 {offsets = [0, 0], sizes = [1, 128], strides = [1, 1]} : vector<8x128xf32> to vector<1x128xf32>
    %c0_11 = arith.constant 0 : index
    %c0_12 = arith.constant 0 : index
    %22 = vector.load %arg6[%c0_11, %c0_12] : memref<8x128xf32, #tpu.memory_space<vmem>>, vector<8x128xf32>
    %23 = vector.extract_strided_slice %22 {offsets = [0, 0], sizes = [1, 128], strides = [1, 1]} : vector<8x128xf32> to vector<1x128xf32>
    %cst_13 = arith.constant 3.000000e-01 : f32
    %24 = vector.broadcast %cst_13 : f32 to vector<1x128xf32>
    %25 = arith.mulf %23, %24 : vector<1x128xf32>
    %26 = arith.addf %21, %25 : vector<1x128xf32>
    %27 = math.tanh %26 : vector<1x128xf32>
    %c1_i32_14 = arith.constant 1 : i32
    %28 = tpu.dynamic_rotate %19 by %c1_i32_14 dim 1 : vector<1x128xf32>, i32 -> vector<1x128xf32>
    %c127_i32_15 = arith.constant 127 : i32
    %29 = tpu.dynamic_rotate %27 by %c127_i32_15 dim 1 : vector<1x128xf32>, i32 -> vector<1x128xf32>
    %c0_i32 = arith.constant 0 : i32
    %30 = arith.cmpi sgt, %arg0, %c0_i32 : i32
    %31 = arith.extui %30 : i1 to i32
    %32 = arith.sitofp %31 : i32 to f32
    %33 = vector.broadcast %32 : f32 to vector<1x128xf32>
    %34 = arith.mulf %28, %33 : vector<1x128xf32>
    %c0_i32_16 = arith.constant 0 : i32
    %35 = arith.cmpi slt, %arg0, %c0_i32_16 : i32
    %36 = arith.extui %35 : i1 to i32
    %37 = arith.sitofp %36 : i32 to f32
    %38 = vector.broadcast %37 : f32 to vector<1x128xf32>
    %39 = arith.mulf %29, %38 : vector<1x128xf32>
    %c0_i32_17 = arith.constant 0 : i32
    %40 = vector.broadcast %c0_i32_17 : i32 to vector<8x128xi32>
    %41 = arith.cmpi eq, %7, %40 : vector<8x128xi32>
    %c0_i32_18 = arith.constant 0 : i32
    %42 = vector.broadcast %c0_i32_18 : i32 to vector<8x128xi32>
    %43 = arith.cmpi eq, %6, %42 : vector<8x128xi32>
    %44 = vector.shape_cast %34 : vector<1x128xf32> to vector<1x128xf32>
    %45 = vector.broadcast %44 : vector<1x128xf32> to vector<8x128xf32>
    %46 = arith.select %43, %45, %10 : vector<8x128xi1>, vector<8x128xf32>
    %47 = arith.select %41, %46, %8 : vector<8x128xi1>, vector<8x128xf32>
    %c127_i32_19 = arith.constant 127 : i32
    %48 = vector.broadcast %c127_i32_19 : i32 to vector<8x128xi32>
    %49 = arith.cmpi eq, %7, %48 : vector<8x128xi32>
    %c7_i32_20 = arith.constant 7 : i32
    %50 = vector.broadcast %c7_i32_20 : i32 to vector<8x128xi32>
    %51 = arith.cmpi eq, %6, %50 : vector<8x128xi32>
    %52 = vector.shape_cast %39 : vector<1x128xf32> to vector<1x128xf32>
    %53 = vector.broadcast %52 : vector<1x128xf32> to vector<8x128xf32>
    %54 = arith.select %51, %53, %11 : vector<8x128xi1>, vector<8x128xf32>
    %55 = arith.select %49, %54, %9 : vector<8x128xi1>, vector<8x128xf32>
    %56 = arith.addf %47, %55 : vector<8x128xf32>
    %c1024_i32 = arith.constant 1024 : i32
    %57 = arith.muli %arg0, %c1024_i32 : i32
    %c128_i32 = arith.constant 128 : i32
    %58 = vector.broadcast %c128_i32 : i32 to vector<8x128xi32>
    %59 = arith.muli %6, %58 : vector<8x128xi32>
    %60 = vector.broadcast %57 : i32 to vector<8x128xi32>
    %61 = arith.addi %60, %59 : vector<8x128xi32>
    %62 = arith.addi %61, %7 : vector<8x128xi32>
    %c0_i32_21 = arith.constant 0 : i32
    %63 = vector.broadcast %c0_i32_21 : i32 to vector<8x128xi32>
    %64 = arith.cmpi eq, %62, %63 : vector<8x128xi32>
    %c99_i32 = arith.constant 99 : i32
    %65 = vector.broadcast %c99_i32 : i32 to vector<8x128xi32>
    %66 = arith.cmpi eq, %62, %65 : vector<8x128xi32>
    %67 = arith.ori %64, %66 : vector<8x128xi1>
    %cst_22 = arith.constant 0.666666686 : f32
    %cst_23 = arith.constant 0.333333343 : f32
    %68 = vector.broadcast %cst_22 : f32 to vector<8x128xf32>
    %69 = vector.broadcast %cst_23 : f32 to vector<8x128xf32>
    %70 = arith.select %67, %68, %69 : vector<8x128xi1>, vector<8x128xf32>
    %cst_24 = arith.constant 0.333333343 : f32
    %71 = vector.broadcast %cst_24 : f32 to vector<8x128xf32>
    %72 = arith.mulf %56, %71 : vector<8x128xf32>
    %73 = arith.mulf %5, %70 : vector<8x128xf32>
    %74 = arith.addf %72, %73 : vector<8x128xf32>
    %75 = arith.subf %74, %5 : vector<8x128xf32>
    %cst_25 = arith.constant 5.000000e-01 : f32
    %76 = vector.broadcast %cst_25 : f32 to vector<8x128xf32>
    %77 = arith.mulf %76, %75 : vector<8x128xf32>
    %78 = arith.addf %5, %77 : vector<8x128xf32>
    %c0_26 = arith.constant 0 : index
    %c0_27 = arith.constant 0 : index
    %79 = vector.load %arg7[%c0_26, %c0_27] : memref<8x128xf32, #tpu.memory_space<vmem>>, vector<8x128xf32>
    tpu.vector_store %arg7[%c0_26, %c0_27], %78 {strides = array<i32>} : memref<8x128xf32, #tpu.memory_space<vmem>>, vector<8x128xf32>,
    return
  }
  func.func @transform_0(%arg0: i32) -> (i32, i32) {
    %c0_i32 = arith.constant 0 : i32
    %c0_i32_0 = arith.constant 0 : i32
    return %arg0, %c0_i32 : i32, i32
  }
  func.func @transform_1(%arg0: i32) -> (i32, i32) {
    %c0_i32 = arith.constant 0 : i32
    %c0_i32_0 = arith.constant 0 : i32
    return %arg0, %c0_i32 : i32, i32
  }
  func.func @transform_2(%arg0: i32) -> (i32, i32) {
    %c1_i32 = arith.constant 1 : i32
    %0 = arith.muli %arg0, %c1_i32 : i32
    %c1_i32_0 = arith.constant 1 : i32
    %1 = arith.subi %0, %c1_i32_0 : i32
    %c0_i32 = arith.constant 0 : i32
    %2 = arith.maxsi %1, %c0_i32 : i32
    %c0_i32_1 = arith.constant 0 : i32
    %c0_i32_2 = arith.constant 0 : i32
    return %2, %c0_i32_1 : i32, i32
  }
  func.func @transform_3(%arg0: i32) -> (i32, i32) {
    %c1_i32 = arith.constant 1 : i32
    %0 = arith.muli %arg0, %c1_i32 : i32
    %c1_i32_0 = arith.constant 1 : i32
    %1 = arith.subi %0, %c1_i32_0 : i32
    %c0_i32 = arith.constant 0 : i32
    %2 = arith.maxsi %1, %c0_i32 : i32
    %c0_i32_1 = arith.constant 0 : i32
    %c0_i32_2 = arith.constant 0 : i32
    return %2, %c0_i32_1 : i32, i32
  }
  func.func @transform_4(%arg0: i32) -> (i32, i32) {
    %c1_i32 = arith.constant 1 : i32
    %0 = arith.addi %arg0, %c1_i32 : i32
    %c1_i32_0 = arith.constant 1 : i32
    %1 = arith.muli %0, %c1_i32_0 : i32
    %c0_i32 = arith.constant 0 : i32
    %2 = arith.minsi %1, %c0_i32 : i32
    %c0_i32_1 = arith.constant 0 : i32
    %c0_i32_2 = arith.constant 0 : i32
    return %2, %c0_i32_1 : i32, i32
  }
  func.func @transform_5(%arg0: i32) -> (i32, i32) {
    %c1_i32 = arith.constant 1 : i32
    %0 = arith.addi %arg0, %c1_i32 : i32
    %c1_i32_0 = arith.constant 1 : i32
    %1 = arith.muli %0, %c1_i32_0 : i32
    %c0_i32 = arith.constant 0 : i32
    %2 = arith.minsi %1, %c0_i32 : i32
    %c0_i32_1 = arith.constant 0 : i32
    %c0_i32_2 = arith.constant 0 : i32
    return %2, %c0_i32_1 : i32, i32
  }
  func.func @transform_6(%arg0: i32) -> (i32, i32) {
    %c0_i32 = arith.constant 0 : i32
    %c0_i32_0 = arith.constant 0 : i32
    return %arg0, %c0_i32 : i32, i32
  }
}

</mosaic_0001>

<bundles_post_ra>
// kernel: bioelectric_pattern_formation.1
= control target key start
LH: loop header
LB: loop body
LE: loop exit
PB: predicated region body
PF: predicated region fallthrough
CT: control target
= control target key end

     0   :  { %v136_v16 = vlaneseq  ;;  %v245_v33 = vmov 0.33333334   ;;  %s302_s2 = inlined_call_operand.vmem [shape: f32[8,128], index: 2, kind: input, shape index: {}, may-alias: {0,2,4}]   ;;  %s303_s3 = inlined_call_operand.vmem [shape: f32[8,128], index: 3, kind: input, shape index: {}, may-alias: {1,3,5}]   ;;  %s304_s0 = inlined_call_operand.vmem [shape: f32[8,128], index: 0, kind: input, shape index: {}, may-alias: {0,2,4}]   ;;  %s305_s1 = inlined_call_operand.vmem [shape: f32[8,128], index: 1, kind: input, shape index: {}, may-alias: {1,3,5}]   ;;  %s306_s4 = inlined_call_operand.vmem [shape: f32[8,128], index: 4, kind: input, shape index: {}, may-alias: {0,2,4}]   ;;  %s307_s5 = inlined_call_operand.vmem [shape: f32[8,128], index: 5, kind: input, shape index: {}, may-alias: {1,3,5}]   ;;  %s308_s6 = inlined_call_operand.vmem [shape: f32[8,128], index: 6, kind: output, shape index: {}]  }
   0x1   :  { %v146_v0 = vld [vmem:[%s302_s2] sm:$0xff] }
   0x2   :  { %v147_v1 = vld [vmem:[%s303_s3] sm:$0xff]  ;;  %v137_v17 = vshrl.u32 %v136_v16, 7  ;;  %v139_v19 = vand.u32 127, %v136_v16 }
   0x3   :  { %v148_v2 = vmul.f32 0.3, %v147_v1  ;;  %v131_v3 = vld [vmem:[%s304_s0] sm:$0xff]  ;;  %s243_s0 = smov 1  }
   0x4   :  { %v132_v4 = vld [vmem:[%s305_s1] sm:$0xff]  ;;  %s244_s1 = smov 127   ;;  %v191_v18 = vmul.u32 128, %v137_v17  ;;  %v177_v21 = vsub.s32 0, %v137_v17  ;;  %vm174_vm2 = vcmp.eq.s32.totalorder %v137_v17, 0  ;;  %vm182_vm4 = vcmp.eq.s32.totalorder %v137_v17, 7 }
   0x5   :  { %v152_v5 = vld [vmem:[%s307_s5] sm:$0xff]  ;;  %v133_v6 = vmul.f32 0.3, %v132_v4  ;;  %v149_v9 = vadd.f32 %v148_v2, %v146_v0  ;;  %vm173_vm5 = vcmp.eq.s32.totalorder %v139_v19, 0  ;;  %vm181_vm6 = vcmp.eq.s32.totalorder %v139_v19, 127 }
   0x6   :  { %v151_v7 = vld [vmem:[%s306_s4] sm:$0xff]  ;;  %v153_v8 = vmul.f32 0.3, %v152_v5  ;;  %v194_v20 = vadd.s32 %v191_v18, %v139_v19 }
   0x7   :  { %v134_v10 = vadd.f32 %v133_v6, %v131_v3  ;;  %237 = vtanh.f32 %v149_v9 }
   0x8   :  { %v154_v11 = vadd.f32 %v153_v8, %v151_v7  ;;  %vm195_vm0 = vcmp.eq.s32.totalorder %v194_v20, 0  ;;  %vm196_vm1 = vcmp.eq.s32.totalorder %v194_v20, 99 }
   0x9   :  { %239 = vtanh.f32 %v134_v10  ;;  %vm197_vm3 = vmor %vm195_vm0, %vm196_vm1 }
   0xa   :  { %241 = vtanh.f32 %v154_v11  ;;  %v198_v34 = vsel %vm197_vm3, 0.6666667, %v245_v33 }
  0x11   :  { %v238_v12 = vpop.eup %237 }
  0x12   :  { %v157_v14 = vrot.slane %v238_v12, 7 }
  0x13   :  { %v240_v13 = vpop.eup %239 }
  0x14   :  { %140 = vrot.lane.b32.xlu1 %v240_v13, %s243_s0  ;;  %159 = vrot.lane.b32.xlu0 %v157_v14, %s243_s0  ;;  %v242_v15 = vpop.eup %241  ;;  %v200_v39 = vmul.f32 %v240_v13, %v198_v34 }
  0x18   :  { %142 = vrot.lane.b32.xlu1 %v240_v13, %s244_s1  ;;  %161 = vrot.lane.b32.xlu0 %v242_v15, %s244_s1 }
  0x86   :  { %v141_v22 = vpop.permute.xlu1 %140  ;;  %v160_v23 = vpop.permute.xlu0 %159 }
  0x87   :  { %v167_v24 = vmul.f32 0.0, %v160_v23  ;;  %v144_v26 = vrot.slane %v141_v22, 7 }
  0x89   :  { %v178_v25 = vrot.slane %v167_v24, %v177_v21 }
  0x8a   :  { %v143_v27 = vpop.permute.xlu1 %142  ;;  %v162_v28 = vpop.permute.xlu0 %161 }
  0x8b   :  { %v172_v29 = vmul.f32 0.0, %v162_v28  ;;  %v145_v30 = vrot.slane %v143_v27, 1  ;;  %v179_v31 = vsel %vm174_vm2, %v178_v25, %v144_v26 }
  0x8c   :  { %v180_v36 = vsel %vm173_vm5, %v179_v31, %v141_v22 }
  0x8d   :  { %v186_v32 = vrot.slane %v172_v29, %v177_v21 }
  0x8f   :  { %v187_v35 = vsel %vm182_vm4, %v186_v32, %v145_v30 }
  0x90   :  { %v188_v37 = vsel %vm181_vm6, %v187_v35, %v143_v27 }
  0x91   :  { %v189_v38 = vadd.f32 %v188_v37, %v180_v36 }
  0x93   :  { %v199_v40 = vmul.f32 0.33333334, %v189_v38 }
  0x95   :  { %v201_v41 = vadd.f32 %v200_v39, %v199_v40 }
  0x97   :  { %v202_v42 = vsub.f32 %v201_v41, %v240_v13 }
  0x99   :  { %v203_v43 = vmul.f32 0.5, %v202_v42 }
  0x9b   :  { %v204_v44 = vadd.f32 %v240_v13, %v203_v43 }
  0x9d   :  { %205 = vst [vmem:[%s308_s6] sm:$0xff] %v204_v44 }

</bundles_post_ra>
